<compile_context>
chip_gen: v6e
topology: v6e:2x2x1
jax: 0.10.0
libtpu: 0.0.40
codegen_flags: <defaults>
</compile_context>

<pallas_src>
import functools

import jax
import jax.numpy as jnp
from jax.experimental import pallas as pl
from jax.experimental.pallas import tpu as pltpu


def _patch_embed_kernel(x_ref, w_ref, b_ref, o_ref):
    # x_ref: (TM, K)  w_ref: (K, Npad)  b_ref: (1, Npad) f32  o_ref: (TM, Npad)
    # f32 accumulation + f32 bias add; only the final store casts to o_ref.dtype
    # (bf16 by default -> halves the output HBM stream and vst count).
    acc = jnp.dot(x_ref[...], w_ref[...], preferred_element_type=jnp.float32)
    o_ref[...] = (acc + b_ref[...]).astype(o_ref.dtype)


def _round_up(x, m):
    return ((x + m - 1) // m) * m


def _tpu_generation_defaults():
    """Returns (max_tile_m, num_tensorcores_per_device) tuned per TPU generation.

    v7x: 64 MiB VMEM per TC and 2 TCs per chip -> smaller tiles, even tile count.
    v5e/v6e: 128 MiB VMEM, single TC -> large tiles to amortize per-step overhead.
    """
    try:
        kind = jax.devices()[0].device_kind.lower()
    except Exception:  # pragma: no cover - e.g. no devices during tracing on CPU
        kind = ""
    if "v7" in kind:
        return 2048, 2
    return 4096, 1


def _choose_m_tiling(m, max_tile, num_tc=1):
    """Pick (tile_m, padded_m).

    Preference order:
      1. Divisor tile of m (no row padding), multiple of 128, >= 256, and
         (on multi-TC chips) giving a tile count divisible by num_tc.
      2. Same but relaxing the even-tile-count requirement.
      3. Single full-extent block when m <= max_tile (split in two on multi-TC
         chips when it is cheap to do so).
      4. Fallback: max_tile with zero-padded rows (tile count rounded up to a
         multiple of num_tc on multi-TC chips).
    """
    max_tile = max(256, max_tile - (max_tile % 256))
    if m <= max_tile:
        # Small problem: single full-extent block is always a legal block shape.
        # On 2-TC chips split into two tiles (one per core) when it costs nothing.
        if num_tc > 1 and m >= 512 and m % 2 == 0 and (m // 2) % 8 == 0:
            return m // 2, m
        return m, m
    requirements = (True, False) if num_tc > 1 else (False,)
    for require_even in requirements:
        cand = max_tile
        while cand >= 256:
            if m % cand == 0 and (not require_even or (m // cand) % num_tc == 0):
                return cand, m
            cand -= 128
    # No acceptable divisor: pad rows instead of accepting a tiny tile
    # (a tiny tile explodes grid length at ~0.35 us per step).
    n_tiles = pl.cdiv(m, max_tile)
    if num_tc > 1:
        n_tiles = _round_up(n_tiles, num_tc)
    return max_tile, n_tiles * max_tile


def _vmem_limit_bytes(tm, k, npad, in_itemsize, out_itemsize):
    """Scoped-VMEM budget for the double-buffered pipeline (+50% headroom)."""
    need = (2 * tm * k * in_itemsize        # double-buffered patch tiles
            + 2 * tm * npad * out_itemsize  # double-buffered output tiles
            + k * npad * in_itemsize        # grid-resident weight
            + npad * 4)                     # grid-resident bias (f32)
    limit = int(need * 1.5) + (4 << 20)
    # Never below the 32 MiB scoped default, never above v7x's 64 MiB physical VMEM.
    return int(max(32 << 20, min(limit, 64 << 20)))


def patch_embed_matmul(patches, weight, bias2d, *, out_dtype, max_tile_m, num_tc=1):
    """patches: (M, K), weight: (K, Npad), bias2d: (1, Npad) f32 -> (M, Npad)."""
    M, K = patches.shape
    Kw, Npad = weight.shape
    assert K == Kw
    assert Npad % 128 == 0, "hidden dim must be padded to a multiple of 128"

    tm, m_pad = _choose_m_tiling(M, max_tile_m, num_tc)
    if m_pad != M:
        patches = jnp.pad(patches, ((0, m_pad - M), (0, 0)))

    in_bytes = patches.dtype.itemsize
    out_bytes = jnp.dtype(out_dtype).itemsize
    cost = pl.CostEstimate(
        flops=2 * m_pad * K * Npad,
        bytes_accessed=(m_pad * K * in_bytes + K * Npad * in_bytes
                        + m_pad * Npad * out_bytes),
        transcendentals=0,
    )

    out = pl.pallas_call(
        _patch_embed_kernel,
        out_shape=jax.ShapeDtypeStruct((m_pad, Npad), out_dtype),
        grid=(m_pad // tm,),
        in_specs=[
            pl.BlockSpec((tm, K), lambda i: (i, 0)),    # streamed / double-buffered over M
            pl.BlockSpec((K, Npad), lambda i: (0, 0)),  # VMEM-resident weight
            pl.BlockSpec((1, Npad), lambda i: (0, 0)),  # VMEM-resident bias
        ],
        out_specs=pl.BlockSpec((tm, Npad), lambda i: (i, 0)),
        compiler_params=pltpu.CompilerParams(
            dimension_semantics=("parallel",),  # independent M tiles; 2-TC shard on v7x
            vmem_limit_bytes=_vmem_limit_bytes(tm, K, Npad, in_bytes, out_bytes),
        ),
        cost_estimate=cost,
    )(patches, weight, bias2d)

    if m_pad != M:
        out = out[:M]
    return out


@functools.partial(
    jax.jit,
    static_argnames=("patch_h", "patch_w", "hidden_size", "out_dtype",
                     "max_tile_m", "num_tc"),
)
def _vit_patch_embed_forward(pixel_values, w_kernel, bias2d, *, patch_h, patch_w,
                             hidden_size, out_dtype, max_tile_m, num_tc):
    B, C, H, W = pixel_values.shape
    Hp, Wp = H // patch_h, W // patch_w

    # Patchify: (B, C, H, W) -> (B*Hp*Wp, C*Ph*Pw), (c, kh, kw) flattening order
    # (matches the transposed Conv2d weight layout).
    x = pixel_values.reshape(B, C, Hp, patch_h, Wp, patch_w)
    x = jnp.transpose(x, (0, 2, 4, 1, 3, 5))
    patches = x.reshape(B * Hp * Wp, C * patch_h * patch_w).astype(w_kernel.dtype)

    out = patch_embed_matmul(patches, w_kernel, bias2d,
                             out_dtype=out_dtype, max_tile_m=max_tile_m,
                             num_tc=num_tc)
    out = out[:, :hidden_size]  # drop lane padding (no-op when hidden % 128 == 0)
    return out.reshape(B, Hp * Wp, hidden_size)


class ViTPatchEmbeddingsPallas:
    """JAX/Pallas equivalent of the PyTorch ViTPatchEmbeddings module.

    Accuracy/perf trade-off (documented, not silent): by default the MXU inputs
    are bf16 (compute_dtype) and the kernel emits bf16 (out_dtype) while the
    accumulate + bias add stay f32. Pass compute_dtype=out_dtype=jnp.float32 for
    full Conv2d-equivalent precision.
    """

    def __init__(self, image_size, num_channels, hidden_size, key,
                 compute_dtype=jnp.bfloat16, out_dtype=jnp.bfloat16,
                 max_tile_m=None):
        patch_size = 4  # hard-coded in the PyTorch module __init__
        image_size = (image_size, image_size) if isinstance(image_size, int) else tuple(image_size)
        patch_size = (patch_size, patch_size)
        self.image_size = image_size
        self.patch_size = patch_size
        self.num_channels = num_channels
        self.hidden_size = hidden_size
        self.num_patches = (image_size[1] // patch_size[1]) * (image_size[0] // patch_size[0])
        self.out_dtype = out_dtype

        default_tile, num_tc = _tpu_generation_defaults()
        self.max_tile_m = default_tile if max_tile_m is None else max_tile_m
        self.num_tc = num_tc

        k_w, k_b = jax.random.split(key)
        # Conv2d weight: (out_channels, in_channels, kH, kW), kept in f32.
        fan_in = num_channels * patch_size[0] * patch_size[1]
        bound = 1.0 / (fan_in ** 0.5)
        self.conv_weight = jax.random.uniform(
            k_w, (hidden_size, num_channels, patch_size[0], patch_size[1]),
            minval=-bound, maxval=bound, dtype=jnp.float32)
        self.conv_bias = jax.random.uniform(
            k_b, (hidden_size,), minval=-bound, maxval=bound, dtype=jnp.float32)

        # Kernel-ready cached params (computed once, not per forward call):
        #   weight: (C*Ph*Pw, hidden padded to 128) in the matmul compute dtype
        #   bias:   (1, hidden padded to 128) in f32 (accumulation / bias add stay f32)
        K = num_channels * patch_size[0] * patch_size[1]
        n_pad = _round_up(hidden_size, 128)
        w2d = self.conv_weight.reshape(hidden_size, K).T  # (K, hidden)
        self.w_kernel = (
            jnp.zeros((K, n_pad), compute_dtype)
            .at[:, :hidden_size].set(w2d.astype(compute_dtype))
        )
        self.bias2d = (
            jnp.zeros((1, n_pad), jnp.float32)
            .at[:, :hidden_size].set(self.conv_bias)
        )

    def __call__(self, pixel_values):
        B, C, H, W = pixel_values.shape
        if C != self.num_channels:
            raise ValueError(
                "Make sure that the channel dimension of the pixel values match "
                "with the one set in the configuration.")
        return _vit_patch_embed_forward(
            pixel_values, self.w_kernel, self.bias2d,
            patch_h=self.patch_size[0], patch_w=self.patch_size[1],
            hidden_size=self.hidden_size, out_dtype=self.out_dtype,
            max_tile_m=self.max_tile_m, num_tc=self.num_tc)


def _reference(pixel_values, module):
    """Pure-JAX f32 conv reference for verification."""
    out = jax.lax.conv_general_dilated(
        pixel_values, module.conv_weight,
        window_strides=module.patch_size, padding="VALID",
        dimension_numbers=("NCHW", "OIHW", "NCHW"))
    out = out + module.conv_bias[None, :, None, None]
    B, Hd, Hp, Wp = out.shape
    return jnp.transpose(out.reshape(B, Hd, Hp * Wp), (0, 2, 1))


if __name__ == "__main__":
    key = jax.random.PRNGKey(0)
    k_param, k_x = jax.random.split(key)

    batch, channels, image_size, hidden = 2, 4, 16, 32
    pixel_values = jax.random.normal(
        k_x, (batch, channels, image_size, image_size), dtype=jnp.float32)

    # Default (perf) path: bf16 matmul inputs + bf16 output, f32 accumulation.
    module_bf16 = ViTPatchEmbeddingsPallas(image_size, channels, hidden, k_param,
                                           compute_dtype=jnp.bfloat16,
                                           out_dtype=jnp.bfloat16)
    out_bf16 = jax.block_until_ready(module_bf16(pixel_values))
    expected_shape = (batch, module_bf16.num_patches, hidden)
    assert out_bf16.shape == expected_shape, (out_bf16.shape, expected_shape)
    assert out_bf16.dtype == jnp.bfloat16, out_bf16.dtype
    ref = jax.block_until_ready(_reference(pixel_values, module_bf16))
    out_bf16_f32 = out_bf16.astype(jnp.float32)
    assert jnp.allclose(out_bf16_f32, ref, atol=2e-2, rtol=2e-2), \
        float(jnp.max(jnp.abs(out_bf16_f32 - ref)))

    # Full-precision path: identical params, tight tolerance.
    module_f32 = ViTPatchEmbeddingsPallas(image_size, channels, hidden, k_param,
                                          compute_dtype=jnp.float32,
                                          out_dtype=jnp.float32)
    out_f32 = jax.block_until_ready(module_f32(pixel_values))
    assert out_f32.shape == expected_shape, (out_f32.shape, expected_shape)
    assert jnp.allclose(out_f32, ref, atol=1e-5, rtol=1e-5), \
        float(jnp.max(jnp.abs(out_f32 - ref)))

    print("KERNEL_OK")
</pallas_src>

<mosaic_0001>
module attributes {stable_mosaic.version = 11 : i64} {
  func.func @_patch_embed_kernel(%arg0: i32, %arg1: memref<32x64xbf16, #tpu.memory_space<vmem>>, %arg2: memref<64x128xbf16, #tpu.memory_space<vmem>>, %arg3: memref<1x128xf32, #tpu.memory_space<vmem>>, %arg4: memref<32x128xbf16, #tpu.memory_space<vmem>>) attributes {dimension_semantics = [#tpu.dimension_semantics<parallel>], iteration_bounds = array<i64: 1>, scalar_prefetch = 0 : i64, scratch_operands = 0 : i64, tpu.core_type = #tpu.core_type<tc>, window_params = [{transform_indices = @transform_0, window_bounds = array<i64: 32, 64>}, {pipeline_mode = #tpu.pipeline_mode<synchronous>, transform_indices = @transform_1, window_bounds = array<i64: 64, 128>}, {pipeline_mode = #tpu.pipeline_mode<synchronous>, transform_indices = @transform_2, window_bounds = array<i64: 1, 128>}, {transform_indices = @transform_3, window_bounds = array<i64: 32, 128>}]} {
    %c0 = arith.constant 0 : index
    %c0_0 = arith.constant 0 : index
    %0 = vector.load %arg1[%c0, %c0_0] : memref<32x64xbf16, #tpu.memory_space<vmem>>, vector<32x64xbf16>
    %c0_1 = arith.constant 0 : index
    %c0_2 = arith.constant 0 : index
    %1 = vector.load %arg2[%c0_1, %c0_2] : memref<64x128xbf16, #tpu.memory_space<vmem>>, vector<64x128xbf16>
    %cst = arith.constant dense<0.000000e+00> : vector<32x128xf32>
    %2 = tpu.matmul %0, %1, %cst {dimension_numbers = #tpu.dot_dimension_numbers<[1], [0], [0], [1], [0, 0, 1, 1], [], []>} : vector<32x64xbf16>, vector<64x128xbf16>, vector<32x128xf32> -> vector<32x128xf32>
    %c0_3 = arith.constant 0 : index
    %c0_4 = arith.constant 0 : index
    %3 = vector.load %arg3[%c0_3, %c0_4] : memref<1x128xf32, #tpu.memory_space<vmem>>, vector<1x128xf32>
    %4 = vector.broadcast %3 : vector<1x128xf32> to vector<32x128xf32>
    %5 = arith.addf %2, %4 : vector<32x128xf32>
    %6 = arith.truncf %5 : vector<32x128xf32> to vector<32x128xbf16>
    %c0_5 = arith.constant 0 : index
    %c0_6 = arith.constant 0 : index
    %7 = vector.load %arg4[%c0_5, %c0_6] : memref<32x128xbf16, #tpu.memory_space<vmem>>, vector<32x128xbf16>
    tpu.vector_store %arg4[%c0_5, %c0_6], %6 {strides = array<i32>} : memref<32x128xbf16, #tpu.memory_space<vmem>>, vector<32x128xbf16>,
    return
  }
  func.func @transform_0(%arg0: i32) -> (i32, i32) {
    %c0_i32 = arith.constant 0 : i32
    %c0_i32_0 = arith.constant 0 : i32
    return %arg0, %c0_i32 : i32, i32
  }
  func.func @transform_1(%arg0: i32) -> (i32, i32) {
    %c0_i32 = arith.constant 0 : i32
    %c0_i32_0 = arith.constant 0 : i32
    %c0_i32_1 = arith.constant 0 : i32
    return %c0_i32, %c0_i32_0 : i32, i32
  }
  func.func @transform_2(%arg0: i32) -> (i32, i32) {
    %c0_i32 = arith.constant 0 : i32
    %c0_i32_0 = arith.constant 0 : i32
    %c0_i32_1 = arith.constant 0 : i32
    return %c0_i32, %c0_i32_0 : i32, i32
  }
  func.func @transform_3(%arg0: i32) -> (i32, i32) {
    %c0_i32 = arith.constant 0 : i32
    %c0_i32_0 = arith.constant 0 : i32
    return %arg0, %c0_i32 : i32, i32
  }
}

</mosaic_0001>

<bundles_post_ra>
// kernel: _vit_patch_embed_forward.1
= control target key start
LH: loop header
LB: loop body
LE: loop exit
PB: predicated region body
PF: predicated region fallthrough
CT: control target
= control target key end

     0   :  { %vm69_vm0 = vcmask 523264   ;;  %s285_s0 = inlined_call_operand.vmem [shape: bf16[32,64], index: 0, kind: input, shape index: {}]   ;;  %s286_s1 = inlined_call_operand.vmem [shape: bf16[64,128], index: 1, kind: input, shape index: {}]   ;;  %s287_s2 = inlined_call_operand.vmem [shape: f32[1,128], index: 2, kind: input, shape index: {}]   ;;  %s288_s3 = inlined_call_operand.hbm [shape: bf16[32,128], index: 3, kind: output, shape index: {}]  }
   0x1   :  { %v210_v0 = vld [vmem:[%s286_s1 + $0x18] sm:$0xff]   ;;  %v211_v1 = vld [vmem:[%s286_s1 + $0x10] sm:$0xff]   ;;  %v212_v2 = vld [vmem:[%s286_s1 + $0x8] sm:$0xff]  }
   0x2   :  { %195 = vmatprep.subr.bf16.mxu0 %v210_v0  ;;  %v214_v3 = vld [vmem:[%s285_s0] sm:$0xff]  }
   0x3   :  { %196 = vmatpush3.bf16.msra.mxu0 %v210_v0  ;;  %203 = vmatprep.mubr.msk.bf16.mxu0 %vm69_vm0, %v214_v3 }
   0x4   :  { %197 = vmatprep.subr.bf16.mxu0 %v211_v1 }
   0x5   :  { %8 = vsyncpa [#allocation3], 0  ;;  %v213_v4 = vld [vmem:[%s286_s1] sm:$0xff]   ;;  %v215_v5 = vld [vmem:[%s285_s0 + $0x8] sm:$0xff]   ;;  %s238_s26 = smov [#allocation2]  }
   0x6   :  { %v161_v7 = vld [vmem:[%s287_s2] ss:$0 sm:$0xff]  ;;  %s150_s27 = sshll.u32 %s238_s26, 4  ;;  %s151_s27 = int_to_ptr.vmem [resolvable:$true] %s150_s27 }
   0x7   :  { %198 = vmatpush3.bf16.msra.mxu0 %v211_v1  ;;  %s216_s0 = scalar_lea.vmem %s151_s27, 256  ;;  %p221_p1 = scmp.lt.s32.totalorder %s151_s27, %s151_s27 }
   0x8   :  { %199 = vmatprep.subr.bf16.mxu0 %v212_v2  ;;  %p217_p0 = scmp.ne.s32.totalorder %s151_s27, %s216_s0  ;;  %p222_p2 = scmp.lt.s32.totalorder %s216_s0, %s216_s0 }
   0xa   :  { %p223_p3 = por %p222_p2, %p221_p1 }
   0xb   :  { %200 = vmatpush3.bf16.msra.mxu0 %v212_v2 }
   0xc   :  { %201 = vmatprep.subr.bf16.mxu0 %v213_v4  ;;  %p224_p4 = pnand %p223_p3, %p217_p0 }
   0xf   :  { %202 = vmatpush3.bf16.msra.mxu0 %v213_v4 }
  0x12   :  { %204 = vmatmul.mubr.msk.bf16.vlgmr.msra.gmra.mxu0 %vm69_vm0, %v215_v5 }
  0xd2   :  { %v205_v6 = vpop.f32.mrf.mxu0 }
  0xd3   :  { %v119_v10 = vadd.f32 %v205_v6, %v161_v7 }
  0xd4   :  { %v110_v8 = vpop.f32.mrf.mxu0 }
  0xd5   :  { %v111_v13 = vadd.f32 %v161_v7, %v110_v8 }
  0xd6   :  { %v206_v9 = vpop.f32.mrf.mxu0 }
  0xd7   :  { %v122_v11 = vadd.f32 %v206_v9, %v161_v7 }
  0xd8   :  { %v113_v12 = vpop.f32.mrf.mxu0 }
  0xd9   :  { %v186_v14 = vpack.c.bf16 %v122_v11, %v119_v10  ;;  %v114_v15 = vadd.f32 %v161_v7, %v113_v12 }
  0xdb   :  { %188 = vst [vmem:[#allocation2 + $0x8] sm:$0xff] %v186_v14   ;;  %v181_v16 = vpack.c.bf16 %v114_v15, %v111_v13 }
  0xdd   :  { %182 = vst [vmem:[#allocation2] sm:$0xff] %v181_v16  }
  0xde   :  { %227 = shalt.err (!%p224_p4)
}
  0xdf   :  { %s239_s1 = smov 64   ;;  %s240_s2 = smov 4  }
  0xe0   :  { %156 = dma.vmem_to_hbm [thread:$0]  %s151_s27, 256, %s288_s3, [#allocation3], %s239_s1, %s239_s1, %s240_s2  }
  0xe1   :  { %236 = dma.done.wait [#allocation3], 256  }
  0xe2   :  { %237 = vsyncadd [#allocation3], 4294967040 }
  0xe3   :  { %160 = vsyncpa [#allocation3], 1 }

</bundles_post_ra>
